<compile_context>
chip_gen: v6e
topology: v6e:2x2x1
jax: 0.10.0
libtpu: 0.0.40
codegen_flags: <defaults>
</compile_context>

<pallas_src>
import math

import jax
import jax.numpy as jnp
from jax.experimental import pallas as pl
from jax.experimental.pallas import tpu as pltpu


def _round_up(n, m):
    return ((n + m - 1) // m) * m


def _choose_row_tile(m_padded, target):
    """Largest multiple of 8 that divides m_padded and is <= target.

    Prefers a >=2-step row grid (v7x splits 'parallel' axes across its two
    TensorCores) when there is enough work to split.
    """
    if m_padded <= 8:
        return m_padded
    best, t = 8, 8
    upper = min(target, m_padded)
    while t <= upper:
        if m_padded % t == 0:
            best = t
        t += 8
    if best == m_padded:                 # 1-step row grid; try to split in two
        t, cand = 8, 8
        while t <= m_padded // 2:
            if m_padded % t == 0:
                cand = t
            t += 8
        best = cand
    return best


def _plan_hidden(C, H, budget_bytes):
    """Padded hidden size Hp and hidden tile width (k-step size).

    Hidden padding (zero W1 cols / b1 / W2 rows) is numerically exact. Tiles
    are multiples of 256 to fill the 256-wide v6e/v7x MXU.
    """
    if H <= 128:
        return H, H                      # full-dim block, no padding
    per_col_bytes = 4 * max(C, 128)      # bf16 W1 col + W2 row (lane-padded)
    max_th = max(256, (budget_bytes // per_col_bytes) // 256 * 256)
    if H <= max_th:
        Hp = H if H % 128 == 0 else _round_up(H, 256)
        return Hp, Hp                    # whole hidden dim resident, 1 k-step
    th = max_th
    return _round_up(H, th), th


def _vmem_limit_bytes(tm, C, th, x_bytes, out_bytes, wbuf):
    Cl = _round_up(C, 128)
    thl = _round_up(th, 128)
    b = 2 * tm * Cl * x_bytes                 # x tiles (double-buffered)
    b += 2 * tm * Cl * out_bytes              # out tiles
    b += wbuf * 2 * (Cl * thl + thl * Cl)     # W1 + W2 bf16 tiles
    b += wbuf * thl * 4 + Cl * 4              # b1, b2
    b += tm * Cl * 4                          # f32 accumulator scratch
    b += tm * thl * 4                         # hidden intermediate
    limit = int(b * 1.5) + (4 << 20)
    return max(min(limit, 100 << 20), 16 << 20)


# ---------------------------------------------------------------------------
# Kernel: one (row-tile i, hidden-tile k) grid step.
# ---------------------------------------------------------------------------
def ffn_kernel(x_ref, w1_ref, b1_ref, w2_ref, b2_ref, out_ref, acc_ref):
    k = pl.program_id(1)

    @pl.when(k == 0)
    def _():
        acc_ref[...] = jnp.zeros_like(acc_ref)

    # Cast activations to the compute dtype in-kernel (VPU cast hides under
    # the MXU); both matmuls accumulate in f32 on the MXU.
    x = x_ref[...].astype(w1_ref.dtype)
    h = jnp.dot(x, w1_ref[...], preferred_element_type=jnp.float32)
    h = jnp.maximum(h + b1_ref[...], 0.0)                      # bias + ReLU, f32
    acc_ref[...] += jnp.dot(h.astype(w2_ref.dtype), w2_ref[...],
                            preferred_element_type=jnp.float32)

    @pl.when(k == pl.num_programs(1) - 1)
    def _():
        out_ref[...] = (acc_ref[...] + b2_ref[...]).astype(out_ref.dtype)
    # TODO(synk): nn.Dropout is identity at eval / p=0; a training path would
    # need pltpu.prng_seed + pltpu.prng_random_bits with per-tile seed offsets.


# ---------------------------------------------------------------------------
# One-time parameter preparation (NOT in the per-call path).
# ---------------------------------------------------------------------------
def prepare_ffn_params(w1, b1, w2, b2, *, compute_dtype=jnp.bfloat16,
                       weight_budget_bytes=16 << 20):
    """Cast weights to the MXU compute dtype and (only if needed) pad the
    hidden dim. Done once at model setup, not per forward call."""
    C, H = w1.shape
    Hp, h_tile = _plan_hidden(C, H, weight_budget_bytes)
    if Hp == H:
        w1_p = w1.astype(compute_dtype)
        b1_p = b1.astype(jnp.float32).reshape(1, H)
        w2_p = w2.astype(compute_dtype)
    else:
        w1_p = jnp.zeros((C, Hp), compute_dtype).at[:, :H].set(w1.astype(compute_dtype))
        b1_p = jnp.zeros((1, Hp), jnp.float32).at[0, :H].set(b1.astype(jnp.float32))
        w2_p = jnp.zeros((Hp, C), compute_dtype).at[:H, :].set(w2.astype(compute_dtype))
    b2_p = b2.astype(jnp.float32).reshape(1, C)
    return {"w1": w1_p, "b1": b1_p, "w2": w2_p, "b2": b2_p, "h_tile": h_tile}


# ---------------------------------------------------------------------------
# Forward wrapper.
# ---------------------------------------------------------------------------
def feed_forward(x, params, *, row_tile_target=256, out_dtype=None):
    """y = ReLU(x @ W1 + b1) @ W2 + b2  (Dropout = identity at eval / p=0)."""
    orig_shape = x.shape
    C = orig_shape[-1]
    M = int(math.prod(orig_shape[:-1])) if len(orig_shape) > 1 else 1
    out_dtype = x.dtype if out_dtype is None else jnp.dtype(out_dtype)

    w1, b1, w2, b2 = params["w1"], params["b1"], params["w2"], params["b2"]
    h_tile = params["h_tile"]
    Hp = w1.shape[1]
    nk = Hp // h_tile

    # Flatten leading dims (free); never pad/cast feature dims of x. Rows are
    # only padded (rarely) up to a multiple of 8.
    x2 = x.reshape(max(M, 1), C)
    Mp = _round_up(max(M, 1), 8)
    if Mp != M:
        x2 = jnp.zeros((Mp, C), x.dtype).at[:M].set(x2)

    tm = _choose_row_tile(Mp, row_tile_target)
    nrows = Mp // tm

    def run(single_buffer):
        def spec(shape, imap, const=False):
            if const and single_buffer:
                return pl.BlockSpec(shape, imap, pipeline_mode=pl.Buffered(1))
            return pl.BlockSpec(shape, imap)

        wbuf = 1 if (nk == 1 and single_buffer) else 2
        vmem = _vmem_limit_bytes(tm, C, h_tile, x.dtype.itemsize,
                                 out_dtype.itemsize, wbuf)
        out = pl.pallas_call(
            ffn_kernel,
            out_shape=jax.ShapeDtypeStruct((Mp, C), out_dtype),
            grid=(nrows, nk),
            in_specs=[
                spec((tm, C), lambda i, k: (i, 0)),                        # x tile
                spec((C, h_tile), lambda i, k: (0, k), const=nk == 1),     # W1
                spec((1, h_tile), lambda i, k: (0, k), const=nk == 1),     # b1
                spec((h_tile, C), lambda i, k: (k, 0), const=nk == 1),     # W2
                spec((1, C), lambda i, k: (0, 0), const=True),             # b2
            ],
            out_specs=pl.BlockSpec((tm, C), lambda i, k: (i, 0)),
            scratch_shapes=[pltpu.VMEM((tm, C), jnp.float32)],
            compiler_params=pltpu.CompilerParams(
                dimension_semantics=("parallel", "arbitrary"),
                vmem_limit_bytes=vmem),
        )(x2, w1, b1, w2, b2)
        return jax.block_until_ready(out)

    try:
        out = run(True)          # single-buffer constant-index blocks
    except Exception:            # fall back if pipeline_mode/Buffered unsupported
        out = run(False)

    if Mp != M:
        out = out[:M]
    return out.reshape(orig_shape)


# ---------------------------------------------------------------------------
# Pure-JAX reference (f32 end-to-end) for correctness check
# ---------------------------------------------------------------------------
def ref_forward(x, w1, b1, w2, b2):
    h = jnp.maximum(x @ w1 + b1, 0.0)
    return h @ w2 + b2                       # Dropout identity in eval mode


if __name__ == "__main__":
    num_embd = 32
    dropout = 0.0                            # eval-mode / p=0 -> identity
    B, T = 2, 8                              # (batch, seq, num_embd) activations

    key = jax.random.PRNGKey(0)
    kx, k1, k2, k3, k4 = jax.random.split(key, 5)
    x = jax.random.normal(kx, (B, T, num_embd), jnp.float32)

    # PyTorch nn.Linear-style uniform init (weights stored as (in, out)).
    bound1 = 1.0 / math.sqrt(num_embd)
    bound2 = 1.0 / math.sqrt(4 * num_embd)
    w1 = jax.random.uniform(k1, (num_embd, 4 * num_embd), jnp.float32, -bound1, bound1)
    b1 = jax.random.uniform(k2, (4 * num_embd,), jnp.float32, -bound1, bound1)
    w2 = jax.random.uniform(k3, (4 * num_embd, num_embd), jnp.float32, -bound2, bound2)
    b2 = jax.random.uniform(k4, (num_embd,), jnp.float32, -bound2, bound2)

    params = prepare_ffn_params(w1, b1, w2, b2)   # one-time weight cast (bf16)
    y = feed_forward(x, params)
    y = jax.block_until_ready(y)

    assert y.shape == x.shape
    ref = ref_forward(x, w1, b1, w2, b2)
    # bf16 matmul inputs (f32 accumulation) vs. pure-f32 reference.
    assert bool(jnp.allclose(y, ref, rtol=2e-2, atol=2e-2)), "mismatch vs reference"
    print("KERNEL_OK")
</pallas_src>

<mosaic_0001>
module attributes {stable_mosaic.version = 11 : i64} {
  func.func @ffn_kernel(%arg0: i32, %arg1: i32, %arg2: memref<8x32xf32, #tpu.memory_space<vmem>>, %arg3: memref<32x128xbf16, #tpu.memory_space<vmem>>, %arg4: memref<1x128xf32, #tpu.memory_space<vmem>>, %arg5: memref<128x32xbf16, #tpu.memory_space<vmem>>, %arg6: memref<1x32xf32, #tpu.memory_space<vmem>>, %arg7: memref<8x32xf32, #tpu.memory_space<vmem>>, %arg8: memref<8x32xf32, #tpu.memory_space<vmem>>) attributes {dimension_semantics = [#tpu.dimension_semantics<parallel>, #tpu.dimension_semantics<arbitrary>], iteration_bounds = array<i64: 2, 1>, scalar_prefetch = 0 : i64, scratch_operands = 1 : i64, tpu.core_type = #tpu.core_type<tc>, window_params = [{transform_indices = @transform_0, window_bounds = array<i64: 8, 32>}, {pipeline_mode = #tpu.pipeline_mode<synchronous>, transform_indices = @transform_1, window_bounds = array<i64: 32, 128>}, {pipeline_mode = #tpu.pipeline_mode<synchronous>, transform_indices = @transform_2, window_bounds = array<i64: 1, 128>}, {pipeline_mode = #tpu.pipeline_mode<synchronous>, transform_indices = @transform_3, window_bounds = array<i64: 128, 32>}, {pipeline_mode = #tpu.pipeline_mode<synchronous>, transform_indices = @transform_4, window_bounds = array<i64: 1, 32>}, {transform_indices = @transform_5, window_bounds = array<i64: 8, 32>}]} {
    %c0_i32 = arith.constant 0 : i32
    %0 = arith.cmpi eq, %arg1, %c0_i32 : i32
    %1 = arith.extui %0 : i1 to i32
    %c0_i32_0 = arith.constant 0 : i32
    %2 = arith.cmpi ne, %1, %c0_i32_0 : i32
    scf.if %2 {
      %cst_16 = arith.constant 0.000000e+00 : f32
      %21 = vector.broadcast %cst_16 : f32 to vector<8x32xf32>
      %c0_17 = arith.constant 0 : index
      %c0_18 = arith.constant 0 : index
      %22 = vector.load %arg8[%c0_17, %c0_18] : memref<8x32xf32, #tpu.memory_space<vmem>>, vector<8x32xf32>
      tpu.vector_store %arg8[%c0_17, %c0_18], %21 {strides = array<i32>} : memref<8x32xf32, #tpu.memory_space<vmem>>, vector<8x32xf32>,
    } else {
    }
    %c0 = arith.constant 0 : index
    %c0_1 = arith.constant 0 : index
    %3 = vector.load %arg2[%c0, %c0_1] : memref<8x32xf32, #tpu.memory_space<vmem>>, vector<8x32xf32>
    %4 = arith.truncf %3 : vector<8x32xf32> to vector<8x32xbf16>
    %c0_2 = arith.constant 0 : index
    %c0_3 = arith.constant 0 : index
    %5 = vector.load %arg3[%c0_2, %c0_3] : memref<32x128xbf16, #tpu.memory_space<vmem>>, vector<32x128xbf16>
    %cst = arith.constant dense<0.000000e+00> : vector<8x128xf32>
    %6 = tpu.matmul %4, %5, %cst {dimension_numbers = #tpu.dot_dimension_numbers<[1], [0], [0], [1], [0, 0, 1, 1], [], []>} : vector<8x32xbf16>, vector<32x128xbf16>, vector<8x128xf32> -> vector<8x128xf32>
    %c0_4 = arith.constant 0 : index
    %c0_5 = arith.constant 0 : index
    %7 = vector.load %arg4[%c0_4, %c0_5] : memref<1x128xf32, #tpu.memory_space<vmem>>, vector<1x128xf32>
    %8 = vector.broadcast %7 : vector<1x128xf32> to vector<8x128xf32>
    %9 = arith.addf %6, %8 : vector<8x128xf32>
    %cst_6 = arith.constant 0.000000e+00 : f32
    %10 = vector.broadcast %cst_6 : f32 to vector<8x128xf32>
    %11 = arith.maximumf %9, %10 : vector<8x128xf32>
    %c0_7 = arith.constant 0 : index
    %c0_8 = arith.constant 0 : index
    %12 = vector.load %arg8[%c0_7, %c0_8] : memref<8x32xf32, #tpu.memory_space<vmem>>, vector<8x32xf32>
    %13 = arith.truncf %11 : vector<8x128xf32> to vector<8x128xbf16>
    %c0_9 = arith.constant 0 : index
    %c0_10 = arith.constant 0 : index
    %14 = vector.load %arg5[%c0_9, %c0_10] : memref<128x32xbf16, #tpu.memory_space<vmem>>, vector<128x32xbf16>
    %cst_11 = arith.constant dense<0.000000e+00> : vector<8x32xf32>
    %15 = tpu.matmul %13, %14, %cst_11 {dimension_numbers = #tpu.dot_dimension_numbers<[1], [0], [0], [1], [0, 0, 1, 1], [], []>} : vector<8x128xbf16>, vector<128x32xbf16>, vector<8x32xf32> -> vector<8x32xf32>
    %16 = arith.addf %12, %15 : vector<8x32xf32>
    %c0_12 = arith.constant 0 : index
    %c0_13 = arith.constant 0 : index
    %17 = vector.load %arg8[%c0_12, %c0_13] : memref<8x32xf32, #tpu.memory_space<vmem>>, vector<8x32xf32>
    tpu.vector_store %arg8[%c0_12, %c0_13], %16 {strides = array<i32>} : memref<8x32xf32, #tpu.memory_space<vmem>>, vector<8x32xf32>,
    %c0_i32_14 = arith.constant 0 : i32
    %18 = arith.cmpi eq, %arg1, %c0_i32_14 : i32
    %19 = arith.extui %18 : i1 to i32
    %c0_i32_15 = arith.constant 0 : i32
    %20 = arith.cmpi ne, %19, %c0_i32_15 : i32
    scf.if %20 {
      %c0_16 = arith.constant 0 : index
      %c0_17 = arith.constant 0 : index
      %21 = vector.load %arg8[%c0_16, %c0_17] : memref<8x32xf32, #tpu.memory_space<vmem>>, vector<8x32xf32>
      %c0_18 = arith.constant 0 : index
      %c0_19 = arith.constant 0 : index
      %22 = vector.load %arg6[%c0_18, %c0_19] : memref<1x32xf32, #tpu.memory_space<vmem>>, vector<1x32xf32>
      %23 = vector.broadcast %22 : vector<1x32xf32> to vector<8x32xf32>
      %24 = arith.addf %21, %23 : vector<8x32xf32>
      %c0_20 = arith.constant 0 : index
      %c0_21 = arith.constant 0 : index
      %25 = vector.load %arg7[%c0_20, %c0_21] : memref<8x32xf32, #tpu.memory_space<vmem>>, vector<8x32xf32>
      tpu.vector_store %arg7[%c0_20, %c0_21], %24 {strides = array<i32>} : memref<8x32xf32, #tpu.memory_space<vmem>>, vector<8x32xf32>,
    } else {
    }
    return
  }
  func.func @transform_0(%arg0: i32, %arg1: i32) -> (i32, i32) {
    %c0_i32 = arith.constant 0 : i32
    %c0_i32_0 = arith.constant 0 : i32
    return %arg0, %c0_i32 : i32, i32
  }
  func.func @transform_1(%arg0: i32, %arg1: i32) -> (i32, i32) {
    %c0_i32 = arith.constant 0 : i32
    %c0_i32_0 = arith.constant 0 : i32
    return %c0_i32, %arg1 : i32, i32
  }
  func.func @transform_2(%arg0: i32, %arg1: i32) -> (i32, i32) {
    %c0_i32 = arith.constant 0 : i32
    %c0_i32_0 = arith.constant 0 : i32
    return %c0_i32, %arg1 : i32, i32
  }
  func.func @transform_3(%arg0: i32, %arg1: i32) -> (i32, i32) {
    %c0_i32 = arith.constant 0 : i32
    %c0_i32_0 = arith.constant 0 : i32
    return %arg1, %c0_i32 : i32, i32
  }
  func.func @transform_4(%arg0: i32, %arg1: i32) -> (i32, i32) {
    %c0_i32 = arith.constant 0 : i32
    %c0_i32_0 = arith.constant 0 : i32
    %c0_i32_1 = arith.constant 0 : i32
    return %c0_i32, %c0_i32_0 : i32, i32
  }
  func.func @transform_5(%arg0: i32, %arg1: i32) -> (i32, i32) {
    %c0_i32 = arith.constant 0 : i32
    %c0_i32_0 = arith.constant 0 : i32
    return %arg0, %c0_i32 : i32, i32
  }
}

module attributes {stable_mosaic.version = 11 : i64} {
  func.func @ffn_kernel(%arg0: i32, %arg1: i32, %arg2: memref<8x32xf32, #tpu.memory_space<vmem>>, %arg3: memref<32x128xbf16, #tpu.memory_space<vmem>>, %arg4: memref<1x128xf32, #tpu.memory_space<vmem>>, %arg5: memref<128x32xbf16, #tpu.memory_space<vmem>>, %arg6: memref<1x32xf32, #tpu.memory_space<vmem>>, %arg7: memref<8x32xf32, #tpu.memory_space<vmem>>, %arg8: memref<8x32xf32, #tpu.memory_space<vmem>>) attributes {dimension_semantics = [#tpu.dimension_semantics<parallel>, #tpu.dimension_semantics<arbitrary>], iteration_bounds = array<i64: 2, 1>, scalar_prefetch = 0 : i64, scratch_operands = 1 : i64, tpu.core_type = #tpu.core_type<tc>, window_params = [{transform_indices = @transform_0, window_bounds = array<i64: 8, 32>}, {transform_indices = @transform_1, window_bounds = array<i64: 32, 128>}, {transform_indices = @transform_2, window_bounds = array<i64: 1, 128>}, {transform_indices = @transform_3, window_bounds = array<i64: 128, 32>}, {pipeline_mode = #tpu.pipeline_mode<synchronous>, transform_indices = @transform_4, window_bounds = array<i64: 1, 32>}, {transform_indices = @transform_5, window_bounds = array<i64: 8, 32>}]} {
    %c0_i32 = arith.constant 0 : i32
    %0 = arith.cmpi eq, %arg1, %c0_i32 : i32
    %1 = arith.extui %0 : i1 to i32
    %c0_i32_0 = arith.constant 0 : i32
    %2 = arith.cmpi ne, %1, %c0_i32_0 : i32
    scf.if %2 {
      %cst_16 = arith.constant 0.000000e+00 : f32
      %21 = vector.broadcast %cst_16 : f32 to vector<8x32xf32>
      %c0_17 = arith.constant 0 : index
      %c0_18 = arith.constant 0 : index
      %22 = vector.load %arg8[%c0_17, %c0_18] : memref<8x32xf32, #tpu.memory_space<vmem>>, vector<8x32xf32>
      tpu.vector_store %arg8[%c0_17, %c0_18], %21 {strides = array<i32>} : memref<8x32xf32, #tpu.memory_space<vmem>>, vector<8x32xf32>,
    } else {
    }
    %c0 = arith.constant 0 : index
    %c0_1 = arith.constant 0 : index
    %3 = vector.load %arg2[%c0, %c0_1] : memref<8x32xf32, #tpu.memory_space<vmem>>, vector<8x32xf32>
    %4 = arith.truncf %3 : vector<8x32xf32> to vector<8x32xbf16>
    %c0_2 = arith.constant 0 : index
    %c0_3 = arith.constant 0 : index
    %5 = vector.load %arg3[%c0_2, %c0_3] : memref<32x128xbf16, #tpu.memory_space<vmem>>, vector<32x128xbf16>
    %cst = arith.constant dense<0.000000e+00> : vector<8x128xf32>
    %6 = tpu.matmul %4, %5, %cst {dimension_numbers = #tpu.dot_dimension_numbers<[1], [0], [0], [1], [0, 0, 1, 1], [], []>} : vector<8x32xbf16>, vector<32x128xbf16>, vector<8x128xf32> -> vector<8x128xf32>
    %c0_4 = arith.constant 0 : index
    %c0_5 = arith.constant 0 : index
    %7 = vector.load %arg4[%c0_4, %c0_5] : memref<1x128xf32, #tpu.memory_space<vmem>>, vector<1x128xf32>
    %8 = vector.broadcast %7 : vector<1x128xf32> to vector<8x128xf32>
    %9 = arith.addf %6, %8 : vector<8x128xf32>
    %cst_6 = arith.constant 0.000000e+00 : f32
    %10 = vector.broadcast %cst_6 : f32 to vector<8x128xf32>
    %11 = arith.maximumf %9, %10 : vector<8x128xf32>
    %c0_7 = arith.constant 0 : index
    %c0_8 = arith.constant 0 : index
    %12 = vector.load %arg8[%c0_7, %c0_8] : memref<8x32xf32, #tpu.memory_space<vmem>>, vector<8x32xf32>
    %13 = arith.truncf %11 : vector<8x128xf32> to vector<8x128xbf16>
    %c0_9 = arith.constant 0 : index
    %c0_10 = arith.constant 0 : index
    %14 = vector.load %arg5[%c0_9, %c0_10] : memref<128x32xbf16, #tpu.memory_space<vmem>>, vector<128x32xbf16>
    %cst_11 = arith.constant dense<0.000000e+00> : vector<8x32xf32>
    %15 = tpu.matmul %13, %14, %cst_11 {dimension_numbers = #tpu.dot_dimension_numbers<[1], [0], [0], [1], [0, 0, 1, 1], [], []>} : vector<8x128xbf16>, vector<128x32xbf16>, vector<8x32xf32> -> vector<8x32xf32>
    %16 = arith.addf %12, %15 : vector<8x32xf32>
    %c0_12 = arith.constant 0 : index
    %c0_13 = arith.constant 0 : index
    %17 = vector.load %arg8[%c0_12, %c0_13] : memref<8x32xf32, #tpu.memory_space<vmem>>, vector<8x32xf32>
    tpu.vector_store %arg8[%c0_12, %c0_13], %16 {strides = array<i32>} : memref<8x32xf32, #tpu.memory_space<vmem>>, vector<8x32xf32>,
    %c0_i32_14 = arith.constant 0 : i32
    %18 = arith.cmpi eq, %arg1, %c0_i32_14 : i32
    %19 = arith.extui %18 : i1 to i32
    %c0_i32_15 = arith.constant 0 : i32
    %20 = arith.cmpi ne, %19, %c0_i32_15 : i32
    scf.if %20 {
      %c0_16 = arith.constant 0 : index
      %c0_17 = arith.constant 0 : index
      %21 = vector.load %arg8[%c0_16, %c0_17] : memref<8x32xf32, #tpu.memory_space<vmem>>, vector<8x32xf32>
      %c0_18 = arith.constant 0 : index
      %c0_19 = arith.constant 0 : index
      %22 = vector.load %arg6[%c0_18, %c0_19] : memref<1x32xf32, #tpu.memory_space<vmem>>, vector<1x32xf32>
      %23 = vector.broadcast %22 : vector<1x32xf32> to vector<8x32xf32>
      %24 = arith.addf %21, %23 : vector<8x32xf32>
      %c0_20 = arith.constant 0 : index
      %c0_21 = arith.constant 0 : index
      %25 = vector.load %arg7[%c0_20, %c0_21] : memref<8x32xf32, #tpu.memory_space<vmem>>, vector<8x32xf32>
      tpu.vector_store %arg7[%c0_20, %c0_21], %24 {strides = array<i32>} : memref<8x32xf32, #tpu.memory_space<vmem>>, vector<8x32xf32>,
    } else {
    }
    return
  }
  func.func @transform_0(%arg0: i32, %arg1: i32) -> (i32, i32) {
    %c0_i32 = arith.constant 0 : i32
    %c0_i32_0 = arith.constant 0 : i32
    return %arg0, %c0_i32 : i32, i32
  }
  func.func @transform_1(%arg0: i32, %arg1: i32) -> (i32, i32) {
    %c0_i32 = arith.constant 0 : i32
    %c0_i32_0 = arith.constant 0 : i32
    return %c0_i32, %arg1 : i32, i32
  }
  func.func @transform_2(%arg0: i32, %arg1: i32) -> (i32, i32) {
    %c0_i32 = arith.constant 0 : i32
    %c0_i32_0 = arith.constant 0 : i32
    return %c0_i32, %arg1 : i32, i32
  }
  func.func @transform_3(%arg0: i32, %arg1: i32) -> (i32, i32) {
    %c0_i32 = arith.constant 0 : i32
    %c0_i32_0 = arith.constant 0 : i32
    return %arg1, %c0_i32 : i32, i32
  }
  func.func @transform_4(%arg0: i32, %arg1: i32) -> (i32, i32) {
    %c0_i32 = arith.constant 0 : i32
    %c0_i32_0 = arith.constant 0 : i32
    %c0_i32_1 = arith.constant 0 : i32
    return %c0_i32, %c0_i32_0 : i32, i32
  }
  func.func @transform_5(%arg0: i32, %arg1: i32) -> (i32, i32) {
    %c0_i32 = arith.constant 0 : i32
    %c0_i32_0 = arith.constant 0 : i32
    return %arg0, %c0_i32 : i32, i32
  }
}

</mosaic_0001>

<bundles_post_ra>
// kernel: tpu_custom_call.1
= control target key start
LH: loop header
LB: loop body
LE: loop exit
PB: predicated region body
PF: predicated region fallthrough
CT: control target
= control target key end

     0   :  { %10 = vsyncpa [#allocation4], 0  ;;  %s990_s0 = inlined_call_operand.vmem [shape: f32[16,32], index: 0, kind: input, shape index: {}]   ;;  %s991_s1 = inlined_call_operand.vmem [shape: bf16[32,128], index: 1, kind: input, shape index: {}]   ;;  %s992_s2 = inlined_call_operand.vmem [shape: f32[1,128], index: 2, kind: input, shape index: {}]   ;;  %s993_s3 = inlined_call_operand.vmem [shape: bf16[128,32], index: 3, kind: input, shape index: {}]   ;;  %s994_s4 = inlined_call_operand.vmem [shape: f32[1,32], index: 4, kind: input, shape index: {}]   ;;  %s995_s5 = inlined_call_operand.hbm [shape: f32[16,32], index: 5, kind: output, shape index: {}]  }
   0x1   :  { %12 = vsyncpa [#allocation4 + $0x1], 0  ;;  %s851_s18 = smov 0   ;;  %s853_s19 = smov 0  }
   0x2   :  { %s855_s20 = smov 0   ;;  %s857_s21 = smov 0  }
   0x3   :  { %s859_s22 = smov 0   ;;  %s861_s23 = smov 0  }
   0x4 LB: > { %s606_s24 = sadd.s32 4294967295, %s816_s23   ;;  %s607_s25 = sadd.s32 4294967294, %s816_s23   ;;  %s816_s23 = sphi %s861_s23, %s18_s23   ;;  %s812_s22 = sphi %s859_s22, %s1002_s22   ;;  %s808_s21 = sphi %s857_s21, %s1001_s21   ;;  %s804_s20 = sphi %s855_s20, %s1000_s20   ;;  %s800_s19 = sphi %s853_s19, %s999_s19   ;;  %s796_s18 = sphi %s851_s18, %s998_s18  }
   0x5   : > { %s30_s26 = sadd.s32 1, %s812_s22  ;;  %s162_s27 = sadd.s32 1, %s804_s20 }
   0x6   : > { %p32_p0 = scmp.ge.s32.totalorder %s30_s26, 2  ;;  %p172_p1 = scmp.ne.s32.totalorder %s804_s20, %s800_s19 }
   0x7   : > { %p173_p2 = scmp.eq.s32.totalorder %s606_s24, 1  ;;  %p178_p3 = scmp.ne.s32.totalorder %s800_s19, %s796_s18 }
   0x8   : > { %s1004_s26 = smov (%p32_p0, %s30_s26), 0  ;;  %p179_p5 = scmp.eq.s32.totalorder %s607_s25, 1 }
   0x9   : > { %p891_p4 = por %p173_p2, %p172_p1  ;;  %s159_s29 = ssub.s32 %s812_s22, %s1004_s26 }
   0xa   : > { %p613_p6 = scmp.ge.s32.totalorder %s816_s23, 1  ;;  %p160_p7 = scmp.eq.s32.totalorder %s159_s29, 0 }
   0xb   : > { %p898_p8 = por %p179_p5, %p178_p3  ;;  %p229_p9 = scmp.lt.s32.totalorder %s816_s23, 3 }
   0xc   : > { %s904_s6 = scalar_select %p160_p7, %s804_s20, %s162_s27  }
   0xd   : > { %p230_p10 = pnand %p613_p6, %p229_p9 }
   0xe   : > { %p268_p11 = scmp.lt.s32.totalorder (!%p230_p10), %s808_s21, 1  ;;  %s630_s8 = sshll.u32 (!%p230_p10), %s808_s21, 7 }
   0xf   : > { %233 = sbr.rel (%p230_p10) target bundleno = 446 (0x1be), region = 40 }
  0x14   : > { %v730_v0 = vld [vmem:[%s991_s1 + $0x8] sm:$0xff]   ;;  %v818_v1 = vmov 0.0   ;;  %v731_v2 = vld [vmem:[%s991_s1] sm:$0xff]   ;;  %vm819_vm0 = vmmov 0   ;;  %vm290_vm1 = vcmask 261120   ;;  %v732_v3 = vld [vmem:[%s993_s3 + $0x38] sm:$0xff]  }
  0x15   : > { %645 = vmatprep.subr.bf16.mxu0 %v818_v1  ;;  %653 = vmatprep.subr.bf16.mxu1 %v818_v1  ;;  %291 = vst.msk [vmem:[#allocation2] sm:$0xff] %vm290_vm1, %v818_v1  ;;  %s269_s13 = scalar_select %p268_p11, %s808_s21, 1  ;;  %v733_v4 = vld [vmem:[%s993_s3 + $0x30] sm:$0xff]   ;;  %v734_v6 = vld [vmem:[%s993_s3 + $0x28] sm:$0xff]   ;;  %v735_v8 = vld [vmem:[%s993_s3 + $0x20] sm:$0xff]  }
  0x16   : > { %646 = vmatpush3.bf16.msra.mxu0 %v730_v0  ;;  %649 = vmatprep.mubr.msk.bf16.mxu0 %vm819_vm0, %v818_v1  ;;  %v736_v9 = vld [vmem:[%s993_s3 + $0x18] sm:$0xff]   ;;  %v737_v10 = vld [vmem:[%s993_s3 + $0x10] sm:$0xff]   ;;  %v738_v11 = vld [vmem:[%s993_s3 + $0x8] sm:$0xff]  }
  0x17   : > { %647 = vmatprep.subr.bf16.mxu0 %v818_v1  ;;  %669 = vmatprep.mubr.msk.bf16.mxu1 %vm819_vm0, %v818_v1  ;;  %s615_s16 = sshll.u32 %s269_s13, 3  ;;  %v739_v12 = vld [vmem:[%s993_s3] sm:$0xff]   ;;  %s495_s13 = scalar_lea.hbm %s995_s5, %s630_s8 }
  0x18   : > { %654 = vmatpush3.bf16.msra.mxu1 %v732_v3  ;;  %s271_s25 = scalar_lea.vmem %s990_s0, %s615_s16  ;;  %v616_v13 = vld [vmem:[%s992_s2] ss:$0 sm:$0xff]  ;;  %s820_s16 = smov [#allocation3]  }
  0x19   : > { %655 = vmatprep.subr.bf16.mxu1 %v818_v1  ;;  %v292_v5 = vld [vmem:[%s271_s25] sm:$0xff]  ;;  %s265_s25 = sand.u32 1, %s800_s19   ;;  %s744_s17 = sshll.u32 %s820_s16, 4  ;;  %s745_s17 = int_to_ptr.vmem [resolvable:$false] %s744_s17 }
  0x1a   : > { %648 = vmatpush3.bf16.msra.mxu0 %v731_v2  ;;  %v293_v7 = vpack.c.bf16 %v292_v5, %v292_v5  ;;  %s614_s27 = sshll.u32 %s265_s25, 3  ;;  %v628_v27 = vld [vmem:[%s994_s4] ss:$0 sm:$0xff]  ;;  %s484_s14 = scalar_lea.sflag [#allocation4], %s265_s25 }
  0x1b   : > { %s267_s9 = scalar_lea.vmem [#allocation3], %s614_s27  ;;  %s746_s21 = scalar_lea.vmem %s745_s17, 256 }
  0x1c   : > { %656 = vmatpush3.bf16.msra.mxu1 %v733_v4  ;;  %v362_v21 = vld [vmem:[#allocation2] sm:$0xff]  ;;  %s497_s10 = sshll.u32 %s267_s9, 4  ;;  %s498_s10 = int_to_ptr.vmem [resolvable:$true] %s497_s10 }
  0x1d   : > { %657 = vmatprep.subr.bf16.mxu1 %v818_v1  ;;  %650 = vmatmul.mubr.msk.bf16.vlgmr.msra.gmra.mxu0 %vm290_vm1, %v293_v7  ;;  %s740_s15 = scalar_lea.vmem %s498_s10, 128  ;;  %p747_p1 = scmp.lt.s32.totalorder %s498_s10, %s745_s17 }
  0x1e   : > { %p741_p12 = scmp.ne.s32.totalorder %s498_s10, %s740_s15  ;;  %p748_p2 = scmp.lt.s32.totalorder %s746_s21, %s740_s15 }
  0x20   : > { %658 = vmatpush3.bf16.msra.mxu1 %v734_v6  ;;  %p742_p13 = pnand %p741_p12, %p891_p4  ;;  %p749_p3 = por %p748_p2, %p747_p1 }
  0x21   : > { %659 = vmatprep.subr.bf16.mxu1 %v818_v1 }
  0x22   : > { %p743_p0 = pneg %p742_p13 }
  0x24   : > { %660 = vmatpush3.bf16.msra.mxu1 %v735_v8  ;;  %p750_p5 = pnand %p749_p3, %p743_p0 }
  0x25   : > { %661 = vmatprep.subr.bf16.mxu1 %v818_v1 }
  0x28   : > { %662 = vmatpush3.bf16.msra.mxu1 %v736_v9 }
  0x29   : > { %663 = vmatprep.subr.bf16.mxu1 %v818_v1 }
  0x2c   : > { %664 = vmatpush3.bf16.msra.mxu1 %v737_v10 }
  0x2d   : > { %665 = vmatprep.subr.bf16.mxu1 %v818_v1 }
  0x30   : > { %666 = vmatpush3.bf16.msra.mxu1 %v738_v11 }
  0x31   : > { %667 = vmatprep.subr.bf16.mxu1 %v818_v1 }
  0x34   : > { %668 = vmatpush3.bf16.msra.mxu1 %v739_v12 }
  0xdd   : > { %v355_v14 = vpop.f32.mrf.mxu0 }
  0xde   : > { %v356_v15 = vadd.f32 %v616_v13, %v355_v14 }
  0xdf   : > { %v651_v16 = vpop.f32.mrf.mxu0 }
  0xe0   : > { %v361_v17 = vmax.f32 %v356_v15, 0.0 }
  0xe1   : > { %v358_v18 = vpop.f32.mrf.mxu0 }
  0xe2   : > { %v363_v19 = vpack.c.bf16 %v361_v17, %v361_v17 }
  0xe3   : > { %v652_v20 = vpop.f32.mrf.mxu0 }
  0xe4   : > { %670 = vmatmul.mubr.bf16.vlgmr.msra.gmra.mxu1 %v363_v19 }
 0x1a4   : > { %v462_v22 = vpop.f32.mrf.mxu1 }
 0x1a5   : > { %v468_v23 = vadd.f32 %v462_v22, %v362_v21 }
 0x1a6   : > { %v671_v24 = vpop.f32.mrf.mxu1 }
 0x1a7   : > { %469 = vst.msk [vmem:[#allocation2] sm:$0xff] %vm290_vm1, %v468_v23 }
 0x1a8   : > { %v465_v25 = vpop.f32.mrf.mxu1 }
 0x1aa   : > { %v672_v26 = vpop.f32.mrf.mxu1 }
 0x1ae   : > { %v473_v28 = vld [vmem:[#allocation2] sm:$0xff] }
 0x1af   : > { %v481_v29 = vadd.f32 %v628_v27, %v473_v28 }
 0x1b1   : > { %482 = vst.msk [vmem:[%s267_s9] sm:$0xff] %vm290_vm1, %v481_v29 }
 0x1b2   : > { %753 = shalt.err (!%p750_p5)
}
 0x1b3   : > { %s754_s24 = scalar_lea.hbm %s495_s13, 128  ;;  %s758_s29 = scalar_lea.hbm %s995_s5, 256 }
 0x1b4   : > { %p755_p6 = scmp.ne.s32.totalorder %s495_s13, %s754_s24  ;;  %p759_p10 = scmp.lt.s32.totalorder %s495_s13, %s995_s5 }
 0x1b5   : > { %p760_p11 = scmp.lt.s32.totalorder %s758_s29, %s754_s24 }
 0x1b6   : > { %p756_p7 = pnand %p755_p6, %p891_p4 }
 0x1b7   : > { %p761_p12 = por %p760_p11, %p759_p10 }
 0x1b8   : > { %p757_p9 = pneg %p756_p7 }
 0x1ba   : > { %p762_p13 = pnand %p761_p12, %p757_p9 }
 0x1bc   : > { %765 = shalt.err (!%p762_p13)
}
 0x1bd   : > { %673 = dma.vmem_to_hbm [thread:$0]  (%p891_p4), %s498_s10, 128, %s495_s13, %s484_s14  }
 0x1be PF: > { %p679_p0 = scmp.ge.s32.totalorder %s816_s23, 2  ;;  %s509_s9 = sand.u32 1, %s796_s18  }
 0x1bf   : > { %s510_s11 = scalar_lea.sflag [#allocation4], %s509_s9 }
 0x1c0   : > { %p676_p1 = pnand %p679_p0, %p898_p8 }
 0x1c2   : > { %p677_p2 = pneg %p676_p1 }
 0x1c4   : > { %791 = dma.done.wait (%p677_p2), %s510_s11, 128  }
 0x1c5   : > { %793 = vsyncadd (%p677_p2), %s510_s11, 4294967168  ;;  %s18_s23 = sadd.s32 1, %s816_s23   ;;  %s998_s18 = smov %s800_s19 }
 0x1c6   : > { %p15_p3 = scmp.ge.s32.totalorder %s18_s23, 4   ;;  %s999_s19 = smov %s804_s20 }
 0x1c7   : > { %s1000_s20 = smov %s904_s6  ;;  %s1001_s21 = smov %s812_s22 }
 0x1c8   : > { %s1002_s22 = smov %s1004_s26  ;;  %17 = sbr.rel (!%p15_p3) target bundleno = 4 (0x4), region = 92 }
 0x1cd   :  { %515 = vsyncpa [#allocation4], 1 }
 0x1ce   :  { %517 = vsyncpa [#allocation4 + $0x1], 1 }

// kernel: tpu_custom_call.1
= control target key start
LH: loop header
LB: loop body
LE: loop exit
PB: predicated region body
PF: predicated region fallthrough
CT: control target
= control target key end

     0   :  { %10 = vsyncpa [#allocation4], 0  ;;  %s990_s0 = inlined_call_operand.vmem [shape: f32[16,32], index: 0, kind: input, shape index: {}]   ;;  %s991_s1 = inlined_call_operand.vmem [shape: bf16[32,128], index: 1, kind: input, shape index: {}]   ;;  %s992_s2 = inlined_call_operand.vmem [shape: f32[1,128], index: 2, kind: input, shape index: {}]   ;;  %s993_s3 = inlined_call_operand.vmem [shape: bf16[128,32], index: 3, kind: input, shape index: {}]   ;;  %s994_s4 = inlined_call_operand.vmem [shape: f32[1,32], index: 4, kind: input, shape index: {}]   ;;  %s995_s5 = inlined_call_operand.hbm [shape: f32[16,32], index: 5, kind: output, shape index: {}]  }
   0x1   :  { %12 = vsyncpa [#allocation4 + $0x1], 0  ;;  %s851_s18 = smov 0   ;;  %s853_s19 = smov 0  }
   0x2   :  { %s855_s20 = smov 0   ;;  %s857_s21 = smov 0  }
   0x3   :  { %s859_s22 = smov 0   ;;  %s861_s23 = smov 0  }
   0x4 LB: > { %s606_s24 = sadd.s32 4294967295, %s816_s23   ;;  %s607_s25 = sadd.s32 4294967294, %s816_s23   ;;  %s816_s23 = sphi %s861_s23, %s18_s23   ;;  %s812_s22 = sphi %s859_s22, %s1002_s22   ;;  %s808_s21 = sphi %s857_s21, %s1001_s21   ;;  %s804_s20 = sphi %s855_s20, %s1000_s20   ;;  %s800_s19 = sphi %s853_s19, %s999_s19   ;;  %s796_s18 = sphi %s851_s18, %s998_s18  }
   0x5   : > { %s30_s26 = sadd.s32 1, %s812_s22  ;;  %s162_s27 = sadd.s32 1, %s804_s20 }
   0x6   : > { %p32_p0 = scmp.ge.s32.totalorder %s30_s26, 2  ;;  %p172_p1 = scmp.ne.s32.totalorder %s804_s20, %s800_s19 }
   0x7   : > { %p173_p2 = scmp.eq.s32.totalorder %s606_s24, 1  ;;  %p178_p3 = scmp.ne.s32.totalorder %s800_s19, %s796_s18 }
   0x8   : > { %s1004_s26 = smov (%p32_p0, %s30_s26), 0  ;;  %p179_p5 = scmp.eq.s32.totalorder %s607_s25, 1 }
   0x9   : > { %p891_p4 = por %p173_p2, %p172_p1  ;;  %s159_s29 = ssub.s32 %s812_s22, %s1004_s26 }
   0xa   : > { %p613_p6 = scmp.ge.s32.totalorder %s816_s23, 1  ;;  %p160_p7 = scmp.eq.s32.totalorder %s159_s29, 0 }
   0xb   : > { %p898_p8 = por %p179_p5, %p178_p3  ;;  %p229_p9 = scmp.lt.s32.totalorder %s816_s23, 3 }
   0xc   : > { %s904_s6 = scalar_select %p160_p7, %s804_s20, %s162_s27  }
   0xd   : > { %p230_p10 = pnand %p613_p6, %p229_p9 }
   0xe   : > { %p268_p11 = scmp.lt.s32.totalorder (!%p230_p10), %s808_s21, 1  ;;  %s630_s8 = sshll.u32 (!%p230_p10), %s808_s21, 7 }
   0xf   : > { %233 = sbr.rel (%p230_p10) target bundleno = 446 (0x1be), region = 40 }
  0x14   : > { %v730_v0 = vld [vmem:[%s991_s1 + $0x8] sm:$0xff]   ;;  %v818_v1 = vmov 0.0   ;;  %v731_v2 = vld [vmem:[%s991_s1] sm:$0xff]   ;;  %vm819_vm0 = vmmov 0   ;;  %vm290_vm1 = vcmask 261120   ;;  %v732_v3 = vld [vmem:[%s993_s3 + $0x38] sm:$0xff]  }
  0x15   : > { %645 = vmatprep.subr.bf16.mxu0 %v818_v1  ;;  %653 = vmatprep.subr.bf16.mxu1 %v818_v1  ;;  %291 = vst.msk [vmem:[#allocation2] sm:$0xff] %vm290_vm1, %v818_v1  ;;  %s269_s13 = scalar_select %p268_p11, %s808_s21, 1  ;;  %v733_v4 = vld [vmem:[%s993_s3 + $0x30] sm:$0xff]   ;;  %v734_v6 = vld [vmem:[%s993_s3 + $0x28] sm:$0xff]   ;;  %v735_v8 = vld [vmem:[%s993_s3 + $0x20] sm:$0xff]  }
  0x16   : > { %646 = vmatpush3.bf16.msra.mxu0 %v730_v0  ;;  %649 = vmatprep.mubr.msk.bf16.mxu0 %vm819_vm0, %v818_v1  ;;  %v736_v9 = vld [vmem:[%s993_s3 + $0x18] sm:$0xff]   ;;  %v737_v10 = vld [vmem:[%s993_s3 + $0x10] sm:$0xff]   ;;  %v738_v11 = vld [vmem:[%s993_s3 + $0x8] sm:$0xff]  }
  0x17   : > { %647 = vmatprep.subr.bf16.mxu0 %v818_v1  ;;  %669 = vmatprep.mubr.msk.bf16.mxu1 %vm819_vm0, %v818_v1  ;;  %s615_s16 = sshll.u32 %s269_s13, 3  ;;  %v739_v12 = vld [vmem:[%s993_s3] sm:$0xff]   ;;  %s495_s13 = scalar_lea.hbm %s995_s5, %s630_s8 }
  0x18   : > { %654 = vmatpush3.bf16.msra.mxu1 %v732_v3  ;;  %s271_s25 = scalar_lea.vmem %s990_s0, %s615_s16  ;;  %v616_v13 = vld [vmem:[%s992_s2] ss:$0 sm:$0xff]  ;;  %s820_s16 = smov [#allocation3]  }
  0x19   : > { %655 = vmatprep.subr.bf16.mxu1 %v818_v1  ;;  %v292_v5 = vld [vmem:[%s271_s25] sm:$0xff]  ;;  %s265_s25 = sand.u32 1, %s800_s19   ;;  %s744_s17 = sshll.u32 %s820_s16, 4  ;;  %s745_s17 = int_to_ptr.vmem [resolvable:$false] %s744_s17 }
  0x1a   : > { %648 = vmatpush3.bf16.msra.mxu0 %v731_v2  ;;  %v293_v7 = vpack.c.bf16 %v292_v5, %v292_v5  ;;  %s614_s27 = sshll.u32 %s265_s25, 3  ;;  %v628_v27 = vld [vmem:[%s994_s4] ss:$0 sm:$0xff]  ;;  %s484_s14 = scalar_lea.sflag [#allocation4], %s265_s25 }
  0x1b   : > { %s267_s9 = scalar_lea.vmem [#allocation3], %s614_s27  ;;  %s746_s21 = scalar_lea.vmem %s745_s17, 256 }
  0x1c   : > { %656 = vmatpush3.bf16.msra.mxu1 %v733_v4  ;;  %v362_v21 = vld [vmem:[#allocation2] sm:$0xff]  ;;  %s497_s10 = sshll.u32 %s267_s9, 4  ;;  %s498_s10 = int_to_ptr.vmem [resolvable:$true] %s497_s10 }
  0x1d   : > { %657 = vmatprep.subr.bf16.mxu1 %v818_v1  ;;  %650 = vmatmul.mubr.msk.bf16.vlgmr.msra.gmra.mxu0 %vm290_vm1, %v293_v7  ;;  %s740_s15 = scalar_lea.vmem %s498_s10, 128  ;;  %p747_p1 = scmp.lt.s32.totalorder %s498_s10, %s745_s17 }
  0x1e   : > { %p741_p12 = scmp.ne.s32.totalorder %s498_s10, %s740_s15  ;;  %p748_p2 = scmp.lt.s32.totalorder %s746_s21, %s740_s15 }
  0x20   : > { %658 = vmatpush3.bf16.msra.mxu1 %v734_v6  ;;  %p742_p13 = pnand %p741_p12, %p891_p4  ;;  %p749_p3 = por %p748_p2, %p747_p1 }
  0x21   : > { %659 = vmatprep.subr.bf16.mxu1 %v818_v1 }
  0x22   : > { %p743_p0 = pneg %p742_p13 }
  0x24   : > { %660 = vmatpush3.bf16.msra.mxu1 %v735_v8  ;;  %p750_p5 = pnand %p749_p3, %p743_p0 }
  0x25   : > { %661 = vmatprep.subr.bf16.mxu1 %v818_v1 }
  0x28   : > { %662 = vmatpush3.bf16.msra.mxu1 %v736_v9 }
  0x29   : > { %663 = vmatprep.subr.bf16.mxu1 %v818_v1 }
  0x2c   : > { %664 = vmatpush3.bf16.msra.mxu1 %v737_v10 }
  0x2d   : > { %665 = vmatprep.subr.bf16.mxu1 %v818_v1 }
  0x30   : > { %666 = vmatpush3.bf16.msra.mxu1 %v738_v11 }
  0x31   : > { %667 = vmatprep.subr.bf16.mxu1 %v818_v1 }
  0x34   : > { %668 = vmatpush3.bf16.msra.mxu1 %v739_v12 }
  0xdd   : > { %v355_v14 = vpop.f32.mrf.mxu0 }
  0xde   : > { %v356_v15 = vadd.f32 %v616_v13, %v355_v14 }
  0xdf   : > { %v651_v16 = vpop.f32.mrf.mxu0 }
  0xe0   : > { %v361_v17 = vmax.f32 %v356_v15, 0.0 }
  0xe1   : > { %v358_v18 = vpop.f32.mrf.mxu0 }
  0xe2   : > { %v363_v19 = vpack.c.bf16 %v361_v17, %v361_v17 }
  0xe3   : > { %v652_v20 = vpop.f32.mrf.mxu0 }
  0xe4   : > { %670 = vmatmul.mubr.bf16.vlgmr.msra.gmra.mxu1 %v363_v19 }
 0x1a4   : > { %v462_v22 = vpop.f32.mrf.mxu1 }
 0x1a5   : > { %v468_v23 = vadd.f32 %v462_v22, %v362_v21 }
 0x1a6   : > { %v671_v24 = vpop.f32.mrf.mxu1 }
 0x1a7   : > { %469 = vst.msk [vmem:[#allocation2] sm:$0xff] %vm290_vm1, %v468_v23 }
 0x1a8   : > { %v465_v25 = vpop.f32.mrf.mxu1 }
 0x1aa   : > { %v672_v26 = vpop.f32.mrf.mxu1 }
 0x1ae   : > { %v473_v28 = vld [vmem:[#allocation2] sm:$0xff] }
 0x1af   : > { %v481_v29 = vadd.f32 %v628_v27, %v473_v28 }
 0x1b1   : > { %482 = vst.msk [vmem:[%s267_s9] sm:$0xff] %vm290_vm1, %v481_v29 }
 0x1b2   : > { %753 = shalt.err (!%p750_p5)
}
 0x1b3   : > { %s754_s24 = scalar_lea.hbm %s495_s13, 128  ;;  %s758_s29 = scalar_lea.hbm %s995_s5, 256 }
 0x1b4   : > { %p755_p6 = scmp.ne.s32.totalorder %s495_s13, %s754_s24  ;;  %p759_p10 = scmp.lt.s32.totalorder %s495_s13, %s995_s5 }
 0x1b5   : > { %p760_p11 = scmp.lt.s32.totalorder %s758_s29, %s754_s24 }
 0x1b6   : > { %p756_p7 = pnand %p755_p6, %p891_p4 }
 0x1b7   : > { %p761_p12 = por %p760_p11, %p759_p10 }
 0x1b8   : > { %p757_p9 = pneg %p756_p7 }
 0x1ba   : > { %p762_p13 = pnand %p761_p12, %p757_p9 }
 0x1bc   : > { %765 = shalt.err (!%p762_p13)
}
 0x1bd   : > { %673 = dma.vmem_to_hbm [thread:$0]  (%p891_p4), %s498_s10, 128, %s495_s13, %s484_s14  }
 0x1be PF: > { %p679_p0 = scmp.ge.s32.totalorder %s816_s23, 2  ;;  %s509_s9 = sand.u32 1, %s796_s18  }
 0x1bf   : > { %s510_s11 = scalar_lea.sflag [#allocation4], %s509_s9 }
 0x1c0   : > { %p676_p1 = pnand %p679_p0, %p898_p8 }
 0x1c2   : > { %p677_p2 = pneg %p676_p1 }
 0x1c4   : > { %791 = dma.done.wait (%p677_p2), %s510_s11, 128  }
 0x1c5   : > { %793 = vsyncadd (%p677_p2), %s510_s11, 4294967168  ;;  %s18_s23 = sadd.s32 1, %s816_s23   ;;  %s998_s18 = smov %s800_s19 }
 0x1c6   : > { %p15_p3 = scmp.ge.s32.totalorder %s18_s23, 4   ;;  %s999_s19 = smov %s804_s20 }
 0x1c7   : > { %s1000_s20 = smov %s904_s6  ;;  %s1001_s21 = smov %s812_s22 }
 0x1c8   : > { %s1002_s22 = smov %s1004_s26  ;;  %17 = sbr.rel (!%p15_p3) target bundleno = 4 (0x4), region = 92 }
 0x1cd   :  { %515 = vsyncpa [#allocation4], 1 }
 0x1ce   :  { %517 = vsyncpa [#allocation4 + $0x1], 1 }

</bundles_post_ra>
